<compile_context>
chip_gen: v6e
topology: v6e:2x2x1
jax: 0.10.0
libtpu: 0.0.40
codegen_flags: <defaults>
</compile_context>

<pallas_src>
import math
from functools import partial

import numpy as np

import jax
import jax.numpy as jnp
from jax.experimental import pallas as pl
from jax.experimental.pallas import tpu as pltpu

_TARGET_BLOCK_BYTES = 4 * 1024 * 1024  # per-step input block target (reduction)
_MS_SSIM_WEIGHTS = (0.0448, 0.2856, 0.3001, 0.2363, 0.1333)


def _vmem_limit_bytes():
    """Per-generation scoped-VMEM limit (v5e/v6e: 128 MiB phys, v7x: 64 MiB)."""
    try:
        info = pltpu.get_tpu_info()
        cap = getattr(info, "vmem_capacity_bytes", None)
        if cap:
            return int(min(cap * 3 // 4, 100 * 1024 * 1024))
    except Exception:
        pass
    return 32 * 1024 * 1024


# ---------------------------------------------------------------------------
# Kernel 1: sum(log(x)) reduction (bpp terms), lane-dense streaming
# ---------------------------------------------------------------------------
def _log_sum_kernel(x_ref, o_ref, acc_ref, *, n_outer, block_outer, ragged):
    i = pl.program_id(0)
    last = pl.num_programs(0) - 1

    @pl.when(i == 0)
    def _():
        acc_ref[...] = jnp.zeros_like(acc_ref)

    def accumulate(masked):
        logs = jnp.log(x_ref[...].astype(jnp.float32))  # (bo, sub, cols)
        if masked:
            outer = (jax.lax.broadcasted_iota(jnp.int32, logs.shape, 0)
                     + i * block_outer)
            logs = jnp.where(outer < n_outer, logs, 0.0)
        # steady state: pure lane/sublane-parallel VPU adds into (sub, cols)
        acc_ref[...] += jnp.sum(logs, axis=0)

    if ragged:
        # hot path: no mask; only the last step pays the iota + select
        @pl.when(i < last)
        def _():
            accumulate(False)

        @pl.when(i == last)
        def _():
            accumulate(True)
    else:
        accumulate(False)

    @pl.when(i == last)
    def _():
        # the only cross-sublane / cross-lane (XLU) reduce, once per call
        o_ref[...] = jnp.sum(acc_ref[...], keepdims=True)


_LOG_COL_CHOICES = (512, 1024, 256, 2048, 128, 4096, 8192, 64, 32, 16, 8, 4, 2)


def pallas_log_sum(x):
    """sum(log(x)) over all elements of x, streamed lane-dense through VMEM."""
    x = jnp.asarray(x)
    if x.size == 0:
        return jnp.float32(0.0)
    if x.ndim == 0:
        return jnp.log(x.astype(jnp.float32))

    flat = x.reshape(-1)  # row-major flatten: free
    n = flat.shape[0]
    cols = None
    for c in _LOG_COL_CHOICES:
        if n % c == 0:
            cols = c
            break
    if cols is None:
        # rare fallback (no usable divisor): pad with 1.0 -> log(1) == 0
        cols = 512
        pad = (-n) % cols
        if pad:
            flat = jnp.concatenate([flat, jnp.ones((pad,), flat.dtype)])
        n = flat.shape[0]

    rows = n // cols
    sub = math.gcd(rows, 8)          # sublane fill of the accumulator
    n_outer = rows // sub
    x3 = flat.reshape(n_outer, sub, cols)  # free re-view

    slab_bytes = max(1, sub * cols * x3.dtype.itemsize)
    target_outer = max(1, _TARGET_BLOCK_BYTES // slab_bytes)
    block_outer = min(n_outer, target_outer)
    grid = (pl.cdiv(n_outer, block_outer),)
    ragged = (n_outer % block_outer) != 0

    kernel = partial(_log_sum_kernel, n_outer=n_outer,
                     block_outer=block_outer, ragged=ragged)
    out = pl.pallas_call(
        kernel,
        out_shape=jax.ShapeDtypeStruct((1, 1), jnp.float32),
        grid_spec=pltpu.PrefetchScalarGridSpec(
            num_scalar_prefetch=0,
            grid=grid,
            in_specs=[pl.BlockSpec((block_outer, sub, cols),
                                   lambda i: (i, 0, 0))],
            out_specs=pl.BlockSpec((1, 1), lambda i: (0, 0)),
            scratch_shapes=[pltpu.VMEM((sub, cols), jnp.float32)],
        ),
        compiler_params=pltpu.CompilerParams(
            dimension_semantics=("arbitrary",),
            vmem_limit_bytes=_vmem_limit_bytes(),
        ),
    )(x3)
    return out[0, 0]


# ---------------------------------------------------------------------------
# Kernel 2: fused MS-SSIM pyramid (all levels, Bt slices per grid step)
# ---------------------------------------------------------------------------
def _gaussian_1d(ws, sigma):
    xs = np.arange(ws, dtype=np.float64)
    g = np.exp(-((xs - ws // 2) ** 2) / (2.0 * sigma ** 2))
    return (g / g.sum()).astype(np.float32)


def _conv_matrix(n, ws, sigma):
    """(n_out, n) M s.t. M @ x == zero-padded 1-D cross-correlation of x with
    the normalized Gaussian window (PyTorch F.conv2d, padding=ws//2)."""
    pad = ws // 2
    n_out = n + 2 * pad - ws + 1
    g = _gaussian_1d(ws, sigma)
    m = np.zeros((n_out, n), np.float32)
    for i in range(n_out):
        for k in range(ws):
            h = i + k - pad
            if 0 <= h < n:
                m[i, h] = g[k]
    return m


def _pool_matrix(n):
    """(n//2, n) M s.t. M @ x == 1-D average pooling (kernel 2, stride 2)."""
    n_out = n // 2
    m = np.zeros((n_out, n), np.float32)
    for j in range(n_out):
        m[j, 2 * j] = 0.5
        m[j, 2 * j + 1] = 0.5
    return m


def _block_diag(m, k):
    r, c = m.shape
    out = np.zeros((k * r, k * c), np.float32)
    for i in range(k):
        out[i * r:(i + 1) * r, i * c:(i + 1) * c] = m
    return out


def _level_geometry(H, W, levels):
    geo = []
    h, w = H, W
    for _ in range(levels):
        ws = min(h, w, 11)
        pad = ws // 2
        ho = h + 2 * pad - ws + 1
        wo = w + 2 * pad - ws + 1
        geo.append((h, w, ws, ho, wo))
        h, w = h // 2, w // 2
    return geo


def _pick_block_slices(B, H, W, levels, itemsize):
    """Largest divisor Bt of B whose fused-level working set fits a VMEM budget."""
    geo = _level_geometry(H, W, levels)
    budget = 20 * 1024 * 1024
    best = 1
    for d in range(1, B + 1):
        if B % d:
            continue
        if d * H > 1024:                       # keep block-diag matrices sane
            continue
        mat_bytes = 0
        for l, (h, w, _, ho, wo) in enumerate(geo):
            mat_bytes += (d * ho) * (d * h) * 4 + w * wo * 4
            if l < levels - 1:
                mat_bytes += (d * (h // 2)) * (d * h) * 4 + w * (w // 2) * 4
        imgs = 2 * 2 * d * H * W * max(itemsize, 4)    # double-buffered blocks
        live = 12 * d * geo[0][3] * geo[0][4] * 4      # live f32 intermediates
        if 2 * mat_bytes + imgs + live <= budget:
            best = d
    return best


def _make_ms_ssim_kernel(levels, bt, geo, c1, c2):
    n_mats = 2 * levels + 2 * (levels - 1)

    def kernel(*refs):
        i1_ref, i2_ref = refs[0], refs[1]
        mat_refs = refs[2:2 + n_mats]
        out_refs = refs[2 + n_mats:]
        ssim_refs = out_refs[:levels]
        mcs_refs = out_refs[levels:]

        h0, w0 = geo[0][0], geo[0][1]
        # Bt slices stacked along rows -> all ops are single big 2-D matmuls
        x1 = i1_ref[...].reshape(bt * h0, w0).astype(jnp.float32)
        x2 = i2_ref[...].reshape(bt * h0, w0).astype(jnp.float32)

        m = 0
        for l in range(levels):
            khtB = mat_refs[m][...]      # (bt*Ho, bt*H) block-diag Gaussian
            kw = mat_refs[m + 1][...]    # (W, Wo)
            m += 2

            def gconv(x, a=khtB, b=kw):
                t = jnp.dot(a, x, preferred_element_type=jnp.float32)
                return jnp.dot(t, b, preferred_element_type=jnp.float32)

            mu1 = gconv(x1)
            mu2 = gconv(x2)
            mu1_sq = mu1 * mu1
            mu2_sq = mu2 * mu2
            mu12 = mu1 * mu2
            # NOTE: kept in f32 -- sigma = E[x^2] - mu^2 is cancellation-prone
            # (c2 ~ 9e-4); single-pass bf16 here breaks low-variance patches.
            sigma1 = gconv(x1 * x1) - mu1_sq
            sigma2 = gconv(x2 * x2) - mu2_sq
            sigma12 = gconv(x1 * x2) - mu12

            v1 = 2.0 * sigma12 + c2
            v2 = sigma1 + sigma2 + c2
            ssim_map = ((2.0 * mu12 + c1) * v1) / ((mu1_sq + mu2_sq + c1) * v2)
            mcs_map = v1 / v2

            # per-grid-step partial sums (grid axis stays fully parallel)
            ssim_refs[l][...] = jnp.sum(ssim_map, keepdims=True)
            mcs_refs[l][...] = jnp.sum(mcs_map, keepdims=True)

            if l < levels - 1:
                phtB = mat_refs[m][...]      # (bt*(H//2), bt*H) block-diag pool
                pw = mat_refs[m + 1][...]    # (W, W//2)
                m += 2
                # pooled images for the next level stay in VMEM / registers
                x1 = jnp.dot(jnp.dot(phtB, x1, preferred_element_type=jnp.float32),
                             pw, preferred_element_type=jnp.float32)
                x2 = jnp.dot(jnp.dot(phtB, x2, preferred_element_type=jnp.float32),
                             pw, preferred_element_type=jnp.float32)

    return kernel


def pallas_ms_ssim(img1, img2, levels=5, max_val=1.0):
    """MS_SSIM.ms_ssim: img1/img2 are (N, C, H, W); returns the scalar MS-SSIM."""
    N, C, H, W = img1.shape
    geo = _level_geometry(H, W, levels)
    for l, (h, w, _, _, _) in enumerate(geo):
        assert h >= 1 and w >= 1, "image too small for this many levels"
        if l < levels - 1:
            assert h >= 2 and w >= 2, "image too small for a 2x2 avg-pool level"

    B = N * C
    x1 = img1.reshape(B, H, W)
    x2 = img2.reshape(B, H, W)

    bt = _pick_block_slices(B, H, W, levels, img1.dtype.itemsize)
    G = B // bt

    c1 = float((0.01 * max_val) ** 2)
    c2 = float((0.03 * max_val) ** 2)

    mats = []
    for l, (h, w, ws, ho, wo) in enumerate(geo):
        sigma = 1.5 * ws / 11.0
        kht = _conv_matrix(h, ws, sigma)                                 # (Ho, H)
        kw = np.ascontiguousarray(_conv_matrix(w, ws, sigma).T)          # (W, Wo)
        mats.append(jnp.asarray(_block_diag(kht, bt)))                   # (bt*Ho, bt*H)
        mats.append(jnp.asarray(kw))
        if l < levels - 1:
            pht = _pool_matrix(h)                                        # (H//2, H)
            pw = np.ascontiguousarray(_pool_matrix(w).T)                 # (W, W//2)
            mats.append(jnp.asarray(_block_diag(pht, bt)))               # (bt*H//2, bt*H)
            mats.append(jnp.asarray(pw))
    mat_specs = [pl.BlockSpec(m.shape, lambda g: (0, 0)) for m in mats]

    kernel = _make_ms_ssim_kernel(levels, bt, geo, c1, c2)

    out_shapes = tuple(jax.ShapeDtypeStruct((G, 1), jnp.float32)
                       for _ in range(2 * levels))
    out_specs = tuple(pl.BlockSpec((1, 1), lambda g: (g, 0))
                      for _ in range(2 * levels))

    outs = pl.pallas_call(
        kernel,
        out_shape=out_shapes,
        grid_spec=pltpu.PrefetchScalarGridSpec(
            num_scalar_prefetch=0,
            grid=(G,),
            in_specs=[pl.BlockSpec((bt, H, W), lambda g: (g, 0, 0)),
                      pl.BlockSpec((bt, H, W), lambda g: (g, 0, 0))] + mat_specs,
            out_specs=out_specs,
        ),
        compiler_params=pltpu.CompilerParams(
            dimension_semantics=("parallel",),   # per-block partials; v7x 2-TC OK
            vmem_limit_bytes=_vmem_limit_bytes(),
        ),
    )(x1, x2, *mats)

    ssim_parts = outs[:levels]
    mcs_parts = outs[levels:]
    msssim, mcs = [], []
    for l, (_, _, _, ho, wo) in enumerate(geo):
        denom = jnp.float32(B * ho * wo)
        msssim.append(jnp.sum(ssim_parts[l]) / denom)
        mcs.append(jnp.sum(mcs_parts[l]) / denom)

    value = msssim[levels - 1] ** _MS_SSIM_WEIGHTS[levels - 1]
    for i in range(levels - 1):
        value = value * (mcs[i] ** _MS_SSIM_WEIGHTS[i])
    return value


# ---------------------------------------------------------------------------
# Multi_MS_SSIM_Loss.forward
# ---------------------------------------------------------------------------
def multi_ms_ssim_loss_forward(output, target, lmbda, max_val=1.0, levels=5):
    num_camera = len(target)
    N, _, H, W = target[0].shape
    num_pixels = N * H * W
    scale = -math.log(2.0) * num_pixels

    out = {}
    out["bpp_loss"] = jnp.float32(0.0)
    out["ms_ssim_loss"] = jnp.float32(0.0)
    out["ms_db"] = jnp.float32(0.0)
    for i in range(num_camera):
        bpp_i = sum(pallas_log_sum(l) / scale
                    for l in output["likelihoods"][i].values())
        ms_val = pallas_ms_ssim(output["x_hat"][i], target[i],
                                levels=levels, max_val=max_val)
        ms_i = 1.0 - ms_val
        out["bpp" + str(i)] = bpp_i
        out["ms_ssim" + str(i)] = ms_i
        out["bpp_loss"] = out["bpp_loss"] + bpp_i / num_camera
        out["ms_ssim_loss"] = out["ms_ssim_loss"] + lmbda * ms_i / num_camera
        ms_db_i = jnp.where(ms_i > 0, 10.0 * jnp.log10(1.0 / ms_i), 0.0)
        out["ms_db" + str(i)] = ms_db_i
        out["ms_db"] = out["ms_db"] + ms_db_i / num_camera
    out["loss"] = out["ms_ssim_loss"] + out["bpp_loss"]
    return out


# ---------------------------------------------------------------------------
# Pure-JAX reference (independent: lax.conv / reshape-pool) + demo
# ---------------------------------------------------------------------------
def _ref_ssim(img1, img2, max_val):
    _, c, h, w = img1.shape
    ws = min(h, w, 11)
    sigma = 1.5 * ws / 11.0
    g = jnp.asarray(_gaussian_1d(ws, sigma))
    window = jnp.broadcast_to(jnp.outer(g, g), (c, 1, ws, ws))
    pad = ws // 2

    def conv(x):
        return jax.lax.conv_general_dilated(
            x, window, window_strides=(1, 1),
            padding=[(pad, pad), (pad, pad)],
            feature_group_count=c,
            dimension_numbers=("NCHW", "OIHW", "NCHW"),
            precision=jax.lax.Precision.HIGHEST)

    mu1, mu2 = conv(img1), conv(img2)
    mu1_sq, mu2_sq, mu12 = mu1 ** 2, mu2 ** 2, mu1 * mu2
    s1 = conv(img1 * img1) - mu1_sq
    s2 = conv(img2 * img2) - mu2_sq
    s12 = conv(img1 * img2) - mu12
    c1 = (0.01 * max_val) ** 2
    c2 = (0.03 * max_val) ** 2
    v1 = 2.0 * s12 + c2
    v2 = s1 + s2 + c2
    ssim_map = ((2.0 * mu12 + c1) * v1) / ((mu1_sq + mu2_sq + c1) * v2)
    mcs_map = v1 / v2
    return ssim_map.mean(), mcs_map.mean()


def _ref_pool(x):
    n, c, h, w = x.shape
    hp, wp = h // 2, w // 2
    return x[:, :, : hp * 2, : wp * 2].reshape(n, c, hp, 2, wp, 2).mean(axis=(3, 5))


def _ref_ms_ssim(img1, img2, levels=5, max_val=1.0):
    msssim, mcs = [], []
    a, b = img1, img2
    for _ in range(levels):
        s, m = _ref_ssim(a, b, max_val)
        msssim.append(s)
        mcs.append(m)
        a, b = _ref_pool(a), _ref_pool(b)
    value = msssim[levels - 1] ** _MS_SSIM_WEIGHTS[levels - 1]
    for i in range(levels - 1):
        value = value * (mcs[i] ** _MS_SSIM_WEIGHTS[i])
    return value


def _ref_forward(output, target, lmbda, max_val=1.0, levels=5):
    num_camera = len(target)
    N, _, H, W = target[0].shape
    num_pixels = N * H * W
    out = {"bpp_loss": jnp.float32(0.0), "ms_ssim_loss": jnp.float32(0.0),
           "ms_db": jnp.float32(0.0)}
    for i in range(num_camera):
        bpp_i = sum(jnp.sum(jnp.log(l)) / (-math.log(2.0) * num_pixels)
                    for l in output["likelihoods"][i].values())
        ms_i = 1.0 - _ref_ms_ssim(output["x_hat"][i], target[i], levels, max_val)
        out["bpp" + str(i)] = bpp_i
        out["ms_ssim" + str(i)] = ms_i
        out["bpp_loss"] += bpp_i / num_camera
        out["ms_ssim_loss"] += lmbda * ms_i / num_camera
        ms_db_i = jnp.where(ms_i > 0, 10.0 * jnp.log10(1.0 / ms_i), 0.0)
        out["ms_db" + str(i)] = ms_db_i
        out["ms_db"] += ms_db_i / num_camera
    out["loss"] = out["ms_ssim_loss"] + out["bpp_loss"]
    return out


if __name__ == "__main__":
    key = jax.random.PRNGKey(0)
    ks = jax.random.split(key, 8)

    # 5-level pyramid needs H, W >= 32 (last level convolves a 2x2 image)
    N, C, H, W = 2, 3, 32, 32

    target0 = jax.random.uniform(ks[0], (N, C, H, W), jnp.float32)
    target1 = jax.random.uniform(ks[1], (N, C, H, W), jnp.float32)
    x_hat0 = jnp.clip(target0 + 0.25 * jax.random.normal(ks[2], (N, C, H, W), jnp.float32), 0.0, 1.0)
    x_hat1 = jnp.clip(target1 + 0.25 * jax.random.normal(ks[3], (N, C, H, W), jnp.float32), 0.0, 1.0)

    lik0 = {
        "y": jax.random.uniform(ks[4], (N, 8, H // 4, W // 4), jnp.float32, minval=0.01, maxval=1.0),
        "z": jax.random.uniform(ks[5], (N, 4, H // 8, W // 8), jnp.float32, minval=0.01, maxval=1.0),
    }
    lik1 = {
        "y": jax.random.uniform(ks[6], (N, 8, H // 4, W // 4), jnp.float32, minval=0.01, maxval=1.0),
        "z": jax.random.uniform(ks[7], (N, 4, H // 8, W // 8), jnp.float32, minval=0.01, maxval=1.0),
    }

    output = {"likelihoods": (lik0, lik1), "x_hat": (x_hat0, x_hat1)}
    target = (target0, target1)
    lmbda = 8.0

    res = multi_ms_ssim_loss_forward(output, target, lmbda)
    res = jax.tree_util.tree_map(jax.block_until_ready, res)

    ref = _ref_forward(output, target, lmbda)

    # bpp terms involve no matmuls -> tight check.
    for k in ("bpp0", "bpp1", "bpp_loss"):
        assert jnp.allclose(res[k], ref[k], rtol=1e-4, atol=1e-4), (k, res[k], ref[k])
    # SSIM terms: tolerance is a safety net for backend matmul-precision
    # differences (expected agreement is ~1e-5; all matmuls kept f32).
    for k in ("ms_ssim0", "ms_ssim1", "ms_ssim_loss", "ms_db", "loss"):
        assert jnp.allclose(res[k], ref[k], rtol=2e-2, atol=2e-2), (k, res[k], ref[k])

    print("KERNEL_OK")
</pallas_src>

<mosaic_0001>
module attributes {stable_mosaic.version = 11 : i64} {
  func.func @_log_sum_kernel(%arg0: i32, %arg1: memref<1x2x512xf32, #tpu.memory_space<vmem>>, %arg2: memref<1x1xf32, #tpu.memory_space<vmem>>, %arg3: memref<2x512xf32, #tpu.memory_space<vmem>>) attributes {dimension_semantics = [#tpu.dimension_semantics<arbitrary>], iteration_bounds = array<i64: 1>, scalar_prefetch = 0 : i64, scratch_operands = 1 : i64, tpu.core_type = #tpu.core_type<tc>, window_params = [{transform_indices = @transform_0, window_bounds = array<i64: 1, 2, 512>}, {pipeline_mode = #tpu.pipeline_mode<synchronous>, transform_indices = @transform_1, window_bounds = array<i64: 1, 1>}]} {
    %c0_i32 = arith.constant 0 : i32
    %0 = arith.cmpi eq, %arg0, %c0_i32 : i32
    %1 = arith.extui %0 : i1 to i32
    %c0_i32_0 = arith.constant 0 : i32
    %2 = arith.cmpi ne, %1, %c0_i32_0 : i32
    scf.if %2 {
      %cst_9 = arith.constant 0.000000e+00 : f32
      %12 = vector.broadcast %cst_9 : f32 to vector<2x512xf32>
      %c0_10 = arith.constant 0 : index
      %c0_11 = arith.constant 0 : index
      %13 = vector.load %arg3[%c0_10, %c0_11] : memref<2x512xf32, #tpu.memory_space<vmem>>, vector<2x512xf32>
      tpu.vector_store %arg3[%c0_10, %c0_11], %12 {strides = array<i32>} : memref<2x512xf32, #tpu.memory_space<vmem>>, vector<2x512xf32>,
    } else {
    }
    %c0 = arith.constant 0 : index
    %c0_1 = arith.constant 0 : index
    %c0_2 = arith.constant 0 : index
    %3 = vector.load %arg1[%c0, %c0_1, %c0_2] : memref<1x2x512xf32, #tpu.memory_space<vmem>>, vector<1x2x512xf32>
    %4 = math.log %3 : vector<1x2x512xf32>
    %c0_3 = arith.constant 0 : index
    %c0_4 = arith.constant 0 : index
    %5 = vector.load %arg3[%c0_3, %c0_4] : memref<2x512xf32, #tpu.memory_space<vmem>>, vector<2x512xf32>
    %cst = arith.constant dense<0.000000e+00> : vector<2x512xf32>
    %6 = vector.multi_reduction <add>, %4, %cst [0] : vector<1x2x512xf32> to vector<2x512xf32>
    %7 = arith.addf %5, %6 : vector<2x512xf32>
    %c0_5 = arith.constant 0 : index
    %c0_6 = arith.constant 0 : index
    %8 = vector.load %arg3[%c0_5, %c0_6] : memref<2x512xf32, #tpu.memory_space<vmem>>, vector<2x512xf32>
    tpu.vector_store %arg3[%c0_5, %c0_6], %7 {strides = array<i32>} : memref<2x512xf32, #tpu.memory_space<vmem>>, vector<2x512xf32>,
    %c0_i32_7 = arith.constant 0 : i32
    %9 = arith.cmpi eq, %arg0, %c0_i32_7 : i32
    %10 = arith.extui %9 : i1 to i32
    %c0_i32_8 = arith.constant 0 : i32
    %11 = arith.cmpi ne, %10, %c0_i32_8 : i32
    scf.if %11 {
      %c0_9 = arith.constant 0 : index
      %c0_10 = arith.constant 0 : index
      %12 = vector.load %arg3[%c0_9, %c0_10] : memref<2x512xf32, #tpu.memory_space<vmem>>, vector<2x512xf32>
      %13 = vector.shape_cast %12 : vector<2x512xf32> to vector<1x2x512xf32>
      %cst_11 = arith.constant dense<0.000000e+00> : vector<1xf32>
      %14 = vector.multi_reduction <add>, %13, %cst_11 [1, 2] : vector<1x2x512xf32> to vector<1xf32>
      %15 = vector.shape_cast %14 : vector<1xf32> to vector<1x1x1xf32>
      %16 = vector.extract %15[0, 0, 0] : f32 from vector<1x1x1xf32>
      %17 = vector.broadcast %16 : f32 to vector<1x1xf32>
      %c0_12 = arith.constant 0 : index
      %c0_13 = arith.constant 0 : index
      %18 = vector.load %arg2[%c0_12, %c0_13] : memref<1x1xf32, #tpu.memory_space<vmem>>, vector<1x1xf32>
      tpu.vector_store %arg2[%c0_12, %c0_13], %17 {strides = array<i32>} : memref<1x1xf32, #tpu.memory_space<vmem>>, vector<1x1xf32>,
    } else {
    }
    return
  }
  func.func @transform_0(%arg0: i32) -> (i32, i32, i32) {
    %c0_i32 = arith.constant 0 : i32
    %c0_i32_0 = arith.constant 0 : i32
    %c0_i32_1 = arith.constant 0 : i32
    return %arg0, %c0_i32, %c0_i32_0 : i32, i32, i32
  }
  func.func @transform_1(%arg0: i32) -> (i32, i32) {
    %c0_i32 = arith.constant 0 : i32
    %c0_i32_0 = arith.constant 0 : i32
    %c0_i32_1 = arith.constant 0 : i32
    return %c0_i32, %c0_i32_0 : i32, i32
  }
}

</mosaic_0001>

<bundles_post_ra>
// kernel: tpu_custom_call.1
= control target key start
LH: loop header
LB: loop body
LE: loop exit
PB: predicated region body
PF: predicated region fallthrough
CT: control target
= control target key end

     0   :  { %6 = vsyncpa [#allocation4], 0  ;;  %s164_s0 = inlined_call_operand.hbm [shape: f32[1,2,512], index: 0, kind: input, shape index: {}]   ;;  %s165_s1 = inlined_call_operand.hbm [shape: f32[1,1], index: 1, kind: output, shape index: {}]  }
   0x1   :  { %7 = vsyncpa [#allocation5], 0  ;;  %s145_s6 = smov [#allocation3]  }
   0x2   :  { %s14_s7 = sshll.u32 %s145_s6, 4  ;;  %s15_s7 = int_to_ptr.vmem [resolvable:$true] %s14_s7 }
   0x3   :  { %s109_s8 = scalar_lea.vmem %s15_s7, 128  ;;  %p114_p1 = scmp.lt.s32.totalorder %s15_s7, %s15_s7 }
   0x4   :  { %p110_p0 = scmp.ne.s32.totalorder %s15_s7, %s109_s8  ;;  %p115_p2 = scmp.lt.s32.totalorder %s109_s8, %s109_s8 }
   0x6   :  { %p116_p3 = por %p115_p2, %p114_p1 }
   0x8   :  { %p117_p4 = pnand %p116_p3, %p110_p0 }
   0xa   :  { %120 = shalt.err (!%p117_p4)
}
   0xb   :  { %17 = dma.hbm_to_vmem [thread:$0]  %s164_s0, 128, %s15_s7, [#allocation4]  }
   0xc   :  { %141 = dma.done.wait [#allocation4], 128  }
   0xd   :  { %142 = vsyncadd [#allocation4], 4294967168  ;;  %v26_v0 = vld [vmem:[#allocation3] sm:$0xff]  ;;  %v146_v1 = vmov 1983009808   ;;  %v42_v3 = vlaneseq  ;;  %vm59_vm0 = vcmask 1041408  }
   0xe   :  { %99 = vlog2.f32 %v26_v0  ;;  %v40_v2 = vunpack.c.l.s4 %v146_v1  ;;  %s147_s0 = smov [#allocation6]   ;;  %vm77_vm1 = vcmask 0  }
   0xf   :  { %v43_v5 = vshrl.u32 %v42_v3, 7  ;;  %s85_s11 = sshll.u32 %s147_s0, 4  ;;  %s86_s11 = int_to_ptr.vmem [resolvable:$true] %s85_s11 }
  0x10   :  { %v41_v4 = vunpack.c.0.s8 %v40_v2  ;;  %s121_s13 = scalar_lea.vmem %s86_s11, 16  ;;  %s125_s14 = scalar_lea.vmem %s86_s11, 32 }
  0x11   :  { %p122_p5 = scmp.ne.s32.totalorder %s86_s11, %s121_s13  ;;  %p126_p6 = scmp.lt.s32.totalorder %s86_s11, %s86_s11 }
  0x12   :  { %v44_v6 = vsub.s32 %v41_v4, %v43_v5  ;;  %p127_p7 = scmp.lt.s32.totalorder %s125_s14, %s121_s13 }
  0x14   :  { %p128_p8 = por %p127_p7, %p126_p6 }
  0x16   :  { %p129_p9 = pnand %p128_p8, %p122_p5 }
  0x1b   :  { %v100_v7 = vpop.eup %99 }
  0x1c   :  { %v28_v8 = vmul.f32 0.6931472, %v100_v7 }
  0x1e   :  { %v38_v9 = vcombine.high %v28_v8, %v28_v8  ;;  %v45_v10 = vrot.slane %v28_v8, %v44_v6 }
  0x20   :  { %v52_v11 = vrot.slane %v38_v9, %v44_v6  ;;  %v53_v12 = vcombine.high %v45_v10, %v45_v10  ;;  %v60_v13 = vsel %vm59_vm0, %v45_v10, 0.0 }
  0x22   :  { %v54_v14 = vcombine.high %v52_v11, %v52_v11  ;;  %v61_v15 = vsel %vm59_vm0, %v53_v12, 0.0  ;;  %v63_v16 = vsel %vm59_vm0, %v52_v11, 0.0 }
  0x23   :  { %v62_v17 = vadd.f32 %v61_v15, %v60_v13 }
  0x24   :  { %v65_v18 = vsel %vm59_vm0, %v54_v14, 0.0 }
  0x25   :  { %v64_v19 = vadd.f32 %v63_v16, %v62_v17 }
  0x27   :  { %v66_v20 = vadd.f32 %v65_v18, %v64_v19 }
  0x29   :  { %67 = vadd.xlane.f32.xlu0 %v66_v20 }
  0xb2   :  { %v68_v21 = vpop.xlane.xlu0 %67 }
  0xb3   :  { %v69_v22 = vrot.slane %v68_v21, 4 }
  0xb5   :  { %v70_v23 = vadd.f32 %v69_v22, %v68_v21 }
  0xb7   :  { %v71_v24 = vrot.slane %v70_v23, 2 }
  0xb9   :  { %v72_v25 = vadd.f32 %v71_v24, %v70_v23 }
  0xbb   :  { %v73_v26 = vrot.slane %v72_v25, 1 }
  0xbd   :  { %v74_v27 = vadd.f32 %v73_v26, %v72_v25 }
  0xbf   :  { %94 = vpush %v74_v27 }
  0xf0   :  { %s95_s12 = spop %94 }
  0xf1   :  { %v76_v28 = vstv %s95_s12 }
  0xf2   :  { %78 = vst.msk [vmem:[#allocation6] sm:$0x1] %vm77_vm1, %v76_v28 }
  0xf3   :  { %132 = shalt.err (!%p129_p9)
}
  0xf4   :  { %88 = dma.vmem_to_hbm [thread:$0]  %s86_s11, 16, %s165_s1, [#allocation5]  }
  0xf5   :  { %143 = dma.done.wait [#allocation5], 16  }
  0xf6   :  { %144 = vsyncadd [#allocation5], 4294967280 }
  0xf7   :  { %92 = vsyncpa [#allocation4], 1 }
  0xf8   :  { %93 = vsyncpa [#allocation5], 1 }

</bundles_post_ra>
